<compile_context>
chip_gen: v6e
topology: v6e:2x2x1
jax: 0.10.0
libtpu: 0.0.40
codegen_flags: <defaults>
</compile_context>

<pallas_src>
import functools

import jax
import jax.numpy as jnp
from jax import lax
from jax.experimental import pallas as pl
from jax.experimental.pallas import tpu as pltpu

EPS = 1e-5  # PyTorch BatchNorm1d default eps


def _bn_channels(y, gamma_l, beta_l, avg, inv_m):
    """Per-channel BatchNorm1d in the lane-packed layout (single BN matmul).

    y:        (N, L) f32, L = channels_per_block * Dout
    gamma_l:  (1, L) per-lane gamma (value repeated over each channel's lanes)
    beta_l:   (1, L) per-lane beta
    avg:      (L, L) f32 block-diagonal 0/1 matrix: avg[i, j] = 1 iff lanes i, j
              belong to the same channel (sum-over-channel + broadcast in one dot)
    inv_m:    1 / (N * Dout)
    """
    s1 = jnp.sum(y, axis=0, keepdims=True)             # (1, L)
    s2 = jnp.sum(y * y, axis=0, keepdims=True)         # (1, L)  (same pass)
    stats = jnp.dot(jnp.concatenate([s1, s2], axis=0), avg,
                    preferred_element_type=jnp.float32) * inv_m   # (2, L)
    mean = stats[0:1]
    # Single-pass variance; clamp guards cancellation from going negative.
    # TODO(synk): switch to a two-pass (subtract-mean) variance if exact parity
    # with PyTorch's BatchNorm1d is required for ill-conditioned activations.
    var = jnp.maximum(stats[1:2] - mean * mean, 0.0)
    inv_std = lax.rsqrt(var + EPS)
    scale = gamma_l * inv_std
    shift = beta_l - mean * scale
    return y * scale + shift


def resnet_kernel(x_ref, wf_ref, bf_ref, wh_ref, bh_ref, gh_ref, bnh_ref,
                  gs_ref, bns_ref, avg_ref, o_ref, y_ref, s_ref, *, dout):
    t = pl.program_id(1)                               # hidden-layer step
    n, l = o_ref.shape
    inv_m = 1.0 / (n * dout)
    avg = avg_ref[...]                                 # (L, L)

    @pl.when(t == 0)
    def _():
        # Fused layer0 + skip: one MXU pass, kept f32 (tiny K, latency-bound).
        ys = jnp.dot(x_ref[...], wf_ref[...],
                     preferred_element_type=jnp.float32) + bf_ref[...]  # (N, 2L)
        y_ref[...] = jnp.maximum(ys[:, :l], 0.0)       # the single surviving ReLU
        # Skip-branch BN done up front so it overlaps later weight DMA / compute.
        s_ref[...] = _bn_channels(ys[:, l:], gs_ref[...], bns_ref[...], avg, inv_m)

    # Hidden block t: linear -> BatchNorm1d (no activation; nn.Sequential quirk).
    # Weight for this layer is streamed in per grid step (bf16, f32 accumulate).
    y = jnp.dot(y_ref[...].astype(jnp.bfloat16), wh_ref[...],
                preferred_element_type=jnp.float32) + bh_ref[...]
    y_ref[...] = _bn_channels(y, gh_ref[...], bnh_ref[...], avg, inv_m)

    @pl.when(t == pl.num_programs(1) - 1)
    def _():
        o_ref[...] = y_ref[...] + s_ref[...]           # lane-dense (N, L) store


def _channels_per_block(C, Din, Dout, lane_budget=512):
    """Channels packed per grid step along the lane axis.

    Picks the SMALLEST divisor cb of C with 128-aligned lane widths
    (cb*Din and cb*Dout multiples of 128) and cb*Dout <= lane_budget:
      * bounds block-diagonal zero padding (only 1/cb of hidden-weight bytes
        are non-zero) — biggest win on v5e's HBM bandwidth,
      * keeps per-step VMEM small (v7x 64 MiB),
      * gives G = C/cb >= 2 "parallel" steps for v7x megacore when possible.
    Falls back to cb = C (full-array blocks, always legal) otherwise.
    """
    for cb in range(1, C):
        if C % cb:
            continue
        if ((cb * Dout) % 128 == 0 and (cb * Din) % 128 == 0
                and cb * Dout <= lane_budget):
            return cb
    return C


def _vmem_limit_bytes(N, cb, Din, Dout):
    """Scoped-VMEM request derived from actual block sizes, with headroom."""
    L = cb * Dout
    f32, bf16 = 4, 2
    blocks = (
        2 * N * cb * Din * f32          # x block
        + 2 * cb * Din * 2 * L * f32    # fused w0|ws block
        + 2 * 2 * L * f32               # fused bias
        + 2 * L * L * bf16              # ONE hidden-layer weight (streamed)
        + 2 * 3 * L * f32               # per-layer bias / gamma / beta
        + 2 * 2 * L * f32               # skip gamma / beta
        + 2 * L * L * f32               # per-channel averaging matrix
        + 2 * N * L * f32               # output block
        + 2 * N * L * f32               # y / s scratch
    )
    return int(min(64 << 20, max(2 * blocks + (4 << 20), 16 << 20)))


def _pack_params(params, cb):
    """Block-diagonal, lane-packed weights / per-lane BN params."""
    C, Din, Dout = params["w0"].shape
    nh = params["wh"].shape[1]
    G = C // cb
    L = cb * Dout

    def bd(w):                      # (C, A, B) -> (G, cb*A, cb*B) block-diagonal
        A, B = w.shape[-2:]
        wg = w.reshape(G, cb, A, B)
        eye = jnp.eye(cb, dtype=w.dtype)
        return (wg[:, :, :, None, :] * eye[None, :, None, :, None]
                ).reshape(G, cb * A, cb * B)

    # layer0 and skip fused along the output axis; kept f32 (accuracy, tiny K)
    wf = jnp.concatenate([bd(params["w0"]), bd(params["ws"])], axis=-1)  # (G, cb*Din, 2L)
    bf = jnp.concatenate([params["b0"].reshape(G, 1, L),
                          params["bs"].reshape(G, 1, L)], axis=-1)       # (G, 1, 2L)

    wh = jnp.stack([bd(params["wh"][:, i]) for i in range(nh)], axis=1)
    wh = wh.astype(jnp.bfloat16)                                         # (G, nh, L, L)
    bh = (params["bh"].reshape(G, cb, nh, Dout)
          .transpose(0, 2, 1, 3).reshape(G, nh, 1, L))

    def lanes_h(p):   # (C, nh) -> (G, nh, 1, L), value repeated over channel lanes
        return jnp.repeat(p.reshape(G, cb, nh).transpose(0, 2, 1),
                          Dout, axis=-1).reshape(G, nh, 1, L)

    def lanes_s(p):   # (C, 1) -> (G, 1, L)
        return jnp.repeat(p.reshape(G, cb), Dout, axis=-1).reshape(G, 1, L)

    return dict(wf=wf, bf=bf, wh=wh, bh=bh,
                gh=lanes_h(params["gh"]), bnh=lanes_h(params["bnh"]),
                gs=lanes_s(params["gs"]), bns=lanes_s(params["bns"]))


def block_parallel_resnet_forward(x, params):
    """x: (batch, num_channels, input_dim) float32 — PyTorch layout.

    Note: batch is best kept a multiple of 8; larger batches (up to the MXU
    height) amortize weight DMA / MXU latency essentially for free.
    """
    N, C, Din = x.shape
    Dout = params["w0"].shape[-1]
    nh = params["wh"].shape[1]
    assert nh >= 1, "num_layers must be >= 2"

    cb = _channels_per_block(C, Din, Dout)
    G = C // cb
    L = cb * Dout

    p = _pack_params(params, cb)
    x_packed = x.reshape(N, C * Din)                    # pure reshape, no transpose

    # Block-diagonal 0/1 "averaging" matrix: one matmul does per-channel
    # reduction AND broadcast-back for BatchNorm (replaces seg @ ... @ seg^T).
    lane_ch = jnp.arange(L) // Dout
    avg = (lane_ch[:, None] == lane_ch[None, :]).astype(jnp.float32)     # (L, L)

    kernel = functools.partial(resnet_kernel, dout=Dout)

    out = pl.pallas_call(
        kernel,
        out_shape=jax.ShapeDtypeStruct((N, C * Dout), jnp.float32),
        grid=(G, nh),                                                    # layer axis last
        in_specs=[
            pl.BlockSpec((N, cb * Din), lambda g, t: (0, g)),            # x (lane-packed)
            pl.BlockSpec((None, cb * Din, 2 * L), lambda g, t: (g, 0, 0)),  # fused w0|ws (f32)
            pl.BlockSpec((None, 1, 2 * L), lambda g, t: (g, 0, 0)),      # fused b0|bs
            pl.BlockSpec((None, None, L, L), lambda g, t: (g, t, 0, 0)),  # hidden W (streamed/layer)
            pl.BlockSpec((None, None, 1, L), lambda g, t: (g, t, 0, 0)),  # hidden bias
            pl.BlockSpec((None, None, 1, L), lambda g, t: (g, t, 0, 0)),  # hidden gamma
            pl.BlockSpec((None, None, 1, L), lambda g, t: (g, t, 0, 0)),  # hidden beta
            pl.BlockSpec((None, 1, L), lambda g, t: (g, 0, 0)),          # skip gamma
            pl.BlockSpec((None, 1, L), lambda g, t: (g, 0, 0)),          # skip beta
            pl.BlockSpec((L, L), lambda g, t: (0, 0)),                   # averaging matrix
        ],
        out_specs=pl.BlockSpec((N, L), lambda g, t: (0, g)),             # lane-dense out
        scratch_shapes=[pltpu.VMEM((N, L), jnp.float32),                 # y carry
                        pltpu.VMEM((N, L), jnp.float32)],                # skip carry
        compiler_params=pltpu.CompilerParams(
            dimension_semantics=("parallel", "arbitrary"),
            vmem_limit_bytes=_vmem_limit_bytes(N, cb, Din, Dout)),
    )(x_packed, p["wf"], p["bf"], p["wh"], p["bh"],
      p["gh"], p["bnh"], p["gs"], p["bns"], avg)

    return out.reshape(N, C, Dout)                      # pure reshape, no transpose


def reference_forward(x, params):
    """Pure-JAX f32 reference of the PyTorch forward (for verification)."""
    xc = jnp.transpose(x, (1, 0, 2))                    # (C, N, Din)

    def bn(v, g, b):
        m = jnp.mean(v, axis=(1, 2), keepdims=True)
        var = jnp.mean((v - m) ** 2, axis=(1, 2), keepdims=True)
        return (v - m) / jnp.sqrt(var + EPS) * g[:, None, None] + b[:, None, None]

    y = jnp.einsum("cnd,cde->cne", xc, params["w0"]) + params["b0"]
    y = jnp.maximum(y, 0.0)
    nh = params["wh"].shape[1]
    for i in range(nh):
        y = jnp.einsum("cnd,cde->cne", y, params["wh"][:, i]) + params["bh"][:, i]
        y = bn(y, params["gh"][:, i], params["bnh"][:, i])
    s = jnp.einsum("cnd,cde->cne", xc, params["ws"]) + params["bs"]
    s = bn(s, params["gs"][:, 0], params["bns"][:, 0])
    return jnp.transpose(y + s, (1, 0, 2))


def init_params(key, input_dim, output_dim, num_layers, num_channels):
    nh = num_layers - 1
    ks = jax.random.split(key, 10)
    f32 = jnp.float32
    return {
        "w0": 0.1 * jax.random.normal(ks[0], (num_channels, input_dim, output_dim), f32),
        "b0": 0.1 * jax.random.normal(ks[1], (num_channels, 1, output_dim), f32),
        "wh": 0.1 * jax.random.normal(ks[2], (num_channels, nh, output_dim, output_dim), f32),
        "bh": 0.1 * jax.random.normal(ks[3], (num_channels, nh, 1, output_dim), f32),
        "ws": 0.1 * jax.random.normal(ks[4], (num_channels, input_dim, output_dim), f32),
        "bs": 0.1 * jax.random.normal(ks[5], (num_channels, 1, output_dim), f32),
        "gh": 1.0 + 0.05 * jax.random.normal(ks[6], (num_channels, nh), f32),
        "bnh": 0.05 * jax.random.normal(ks[7], (num_channels, nh), f32),
        "gs": 1.0 + 0.05 * jax.random.normal(ks[8], (num_channels, 1), f32),
        "bns": 0.05 * jax.random.normal(ks[9], (num_channels, 1), f32),
    }


if __name__ == "__main__":
    batch, num_channels, input_dim, output_dim, num_layers = 8, 4, 16, 32, 3

    key = jax.random.PRNGKey(0)
    k_x, k_p = jax.random.split(key)
    x = jax.random.normal(k_x, (batch, num_channels, input_dim), jnp.float32)
    params = init_params(k_p, input_dim, output_dim, num_layers, num_channels)

    fwd = jax.jit(block_parallel_resnet_forward)
    out = jax.block_until_ready(fwd(x, params))
    ref = jax.block_until_ready(reference_forward(x, params))

    assert out.shape == (batch, num_channels, output_dim)
    # hidden layers use bf16 MXU operands (f32 accumulate) vs. the f32
    # reference -> bf16-level tolerance
    assert jnp.allclose(out, ref, rtol=3e-2, atol=3e-2), (
        f"max abs err {jnp.max(jnp.abs(out - ref))}")

    print("KERNEL_OK")
</pallas_src>

<mosaic_0001>
module attributes {stable_mosaic.version = 11 : i64} {
  func.func @resnet_kernel(%arg0: i32, %arg1: i32, %arg2: memref<8x64xf32, #tpu.memory_space<vmem>>, %arg3: memref<1x64x256xf32, #tpu.memory_space<vmem>>, %arg4: memref<1x1x256xf32, #tpu.memory_space<vmem>>, %arg5: memref<1x1x128x128xbf16, #tpu.memory_space<vmem>>, %arg6: memref<1x1x1x128xf32, #tpu.memory_space<vmem>>, %arg7: memref<1x1x1x128xf32, #tpu.memory_space<vmem>>, %arg8: memref<1x1x1x128xf32, #tpu.memory_space<vmem>>, %arg9: memref<1x1x128xf32, #tpu.memory_space<vmem>>, %arg10: memref<1x1x128xf32, #tpu.memory_space<vmem>>, %arg11: memref<128x128xf32, #tpu.memory_space<vmem>>, %arg12: memref<8x128xf32, #tpu.memory_space<vmem>>, %arg13: memref<8x128xf32, #tpu.memory_space<vmem>>, %arg14: memref<8x128xf32, #tpu.memory_space<vmem>>) attributes {dimension_semantics = [#tpu.dimension_semantics<parallel>, #tpu.dimension_semantics<arbitrary>], iteration_bounds = array<i64: 1, 2>, scalar_prefetch = 0 : i64, scratch_operands = 2 : i64, tpu.core_type = #tpu.core_type<tc>, window_params = [{transform_indices = @transform_0, window_bounds = array<i64: 8, 64>}, {transform_indices = @transform_1, window_bounds = array<i64: 1, 64, 256>}, {transform_indices = @transform_2, window_bounds = array<i64: 1, 1, 256>}, {transform_indices = @transform_3, window_bounds = array<i64: 1, 1, 128, 128>}, {transform_indices = @transform_4, window_bounds = array<i64: 1, 1, 1, 128>}, {transform_indices = @transform_5, window_bounds = array<i64: 1, 1, 1, 128>}, {transform_indices = @transform_6, window_bounds = array<i64: 1, 1, 1, 128>}, {transform_indices = @transform_7, window_bounds = array<i64: 1, 1, 128>}, {transform_indices = @transform_8, window_bounds = array<i64: 1, 1, 128>}, {pipeline_mode = #tpu.pipeline_mode<synchronous>, transform_indices = @transform_9, window_bounds = array<i64: 128, 128>}, {transform_indices = @transform_10, window_bounds = array<i64: 8, 128>}]} {
    %c0 = arith.constant 0 : index
    %c0_0 = arith.constant 0 : index
    %0 = vector.load %arg11[%c0, %c0_0] : memref<128x128xf32, #tpu.memory_space<vmem>>, vector<128x128xf32>
    %c0_i32 = arith.constant 0 : i32
    %1 = arith.cmpi eq, %arg1, %c0_i32 : i32
    %2 = arith.extui %1 : i1 to i32
    %c0_i32_1 = arith.constant 0 : i32
    %3 = arith.cmpi ne, %2, %c0_i32_1 : i32
    scf.if %3 {
      %c0_29 = arith.constant 0 : index
      %c0_30 = arith.constant 0 : index
      %46 = vector.load %arg2[%c0_29, %c0_30] : memref<8x64xf32, #tpu.memory_space<vmem>>, vector<8x64xf32>
      %c0_31 = arith.constant 0 : index
      %c0_32 = arith.constant 0 : index
      %c0_33 = arith.constant 0 : index
      %47 = vector.load %arg3[%c0_31, %c0_32, %c0_33] : memref<1x64x256xf32, #tpu.memory_space<vmem>>, vector<1x64x256xf32>
      %48 = vector.shape_cast %47 : vector<1x64x256xf32> to vector<64x256xf32>
      %cst_34 = arith.constant dense<0.000000e+00> : vector<8x256xf32>
      %49 = tpu.matmul %46, %48, %cst_34 {dimension_numbers = #tpu.dot_dimension_numbers<[1], [0], [0], [1], [0, 0, 1, 1], [], []>} : vector<8x64xf32>, vector<64x256xf32>, vector<8x256xf32> -> vector<8x256xf32>
      %c0_35 = arith.constant 0 : index
      %c0_36 = arith.constant 0 : index
      %c0_37 = arith.constant 0 : index
      %50 = vector.load %arg4[%c0_35, %c0_36, %c0_37] : memref<1x1x256xf32, #tpu.memory_space<vmem>>, vector<1x1x256xf32>
      %51 = vector.shape_cast %50 : vector<1x1x256xf32> to vector<1x256xf32>
      %52 = vector.broadcast %51 : vector<1x256xf32> to vector<8x256xf32>
      %53 = arith.addf %49, %52 : vector<8x256xf32>
      %54 = vector.extract_strided_slice %53 {offsets = [0, 0], sizes = [8, 128], strides = [1, 1]} : vector<8x256xf32> to vector<8x128xf32>
      %cst_38 = arith.constant 0.000000e+00 : f32
      %55 = vector.broadcast %cst_38 : f32 to vector<8x128xf32>
      %56 = arith.maximumf %54, %55 : vector<8x128xf32>
      %c0_39 = arith.constant 0 : index
      %c0_40 = arith.constant 0 : index
      %57 = vector.load %arg13[%c0_39, %c0_40] : memref<8x128xf32, #tpu.memory_space<vmem>>, vector<8x128xf32>
      tpu.vector_store %arg13[%c0_39, %c0_40], %56 {strides = array<i32>} : memref<8x128xf32, #tpu.memory_space<vmem>>, vector<8x128xf32>,
      %58 = vector.extract_strided_slice %53 {offsets = [0, 128], sizes = [8, 128], strides = [1, 1]} : vector<8x256xf32> to vector<8x128xf32>
      %c0_41 = arith.constant 0 : index
      %c0_42 = arith.constant 0 : index
      %c0_43 = arith.constant 0 : index
      %59 = vector.load %arg9[%c0_41, %c0_42, %c0_43] : memref<1x1x128xf32, #tpu.memory_space<vmem>>, vector<1x1x128xf32>
      %60 = vector.shape_cast %59 : vector<1x1x128xf32> to vector<1x128xf32>
      %c0_44 = arith.constant 0 : index
      %c0_45 = arith.constant 0 : index
      %c0_46 = arith.constant 0 : index
      %61 = vector.load %arg10[%c0_44, %c0_45, %c0_46] : memref<1x1x128xf32, #tpu.memory_space<vmem>>, vector<1x1x128xf32>
      %62 = vector.shape_cast %61 : vector<1x1x128xf32> to vector<1x128xf32>
      %cst_47 = arith.constant dense<0.000000e+00> : vector<128xf32>
      %63 = vector.multi_reduction <add>, %58, %cst_47 [0] : vector<8x128xf32> to vector<128xf32>
      %64 = vector.shape_cast %63 : vector<128xf32> to vector<1x128xf32>
      %65 = arith.mulf %58, %58 : vector<8x128xf32>
      %cst_48 = arith.constant dense<0.000000e+00> : vector<128xf32>
      %66 = vector.multi_reduction <add>, %65, %cst_48 [0] : vector<8x128xf32> to vector<128xf32>
      %67 = vector.shape_cast %66 : vector<128xf32> to vector<1x128xf32>
      %68 = tpu.concatenate %64, %67 in 0 : vector<1x128xf32>, vector<1x128xf32> -> vector<2x128xf32>
      %cst_49 = arith.constant dense<0.000000e+00> : vector<2x128xf32>
      %69 = tpu.matmul %68, %0, %cst_49 {dimension_numbers = #tpu.dot_dimension_numbers<[1], [0], [0], [1], [0, 0, 1, 1], [], []>} : vector<2x128xf32>, vector<128x128xf32>, vector<2x128xf32> -> vector<2x128xf32>
      %cst_50 = arith.constant 3.906250e-03 : f32
      %70 = vector.broadcast %cst_50 : f32 to vector<2x128xf32>
      %71 = arith.mulf %69, %70 : vector<2x128xf32>
      %72 = vector.extract_strided_slice %71 {offsets = [0, 0], sizes = [1, 128], strides = [1, 1]} : vector<2x128xf32> to vector<1x128xf32>
      %73 = vector.extract_strided_slice %71 {offsets = [1, 0], sizes = [1, 128], strides = [1, 1]} : vector<2x128xf32> to vector<1x128xf32>
      %74 = arith.mulf %72, %72 : vector<1x128xf32>
      %75 = arith.subf %73, %74 : vector<1x128xf32>
      %cst_51 = arith.constant 0.000000e+00 : f32
      %76 = vector.broadcast %cst_51 : f32 to vector<1x128xf32>
      %77 = arith.maximumf %75, %76 : vector<1x128xf32>
      %cst_52 = arith.constant 9.99999974E-6 : f32
      %78 = vector.broadcast %cst_52 : f32 to vector<1x128xf32>
      %79 = arith.addf %77, %78 : vector<1x128xf32>
      %80 = math.rsqrt %79 : vector<1x128xf32>
      %81 = arith.mulf %60, %80 : vector<1x128xf32>
      %82 = arith.mulf %72, %81 : vector<1x128xf32>
      %83 = arith.subf %62, %82 : vector<1x128xf32>
      %84 = vector.broadcast %81 : vector<1x128xf32> to vector<8x128xf32>
      %85 = arith.mulf %58, %84 : vector<8x128xf32>
      %86 = vector.broadcast %83 : vector<1x128xf32> to vector<8x128xf32>
      %87 = arith.addf %85, %86 : vector<8x128xf32>
      %c0_53 = arith.constant 0 : index
      %c0_54 = arith.constant 0 : index
      %88 = vector.load %arg14[%c0_53, %c0_54] : memref<8x128xf32, #tpu.memory_space<vmem>>, vector<8x128xf32>
      tpu.vector_store %arg14[%c0_53, %c0_54], %87 {strides = array<i32>} : memref<8x128xf32, #tpu.memory_space<vmem>>, vector<8x128xf32>,
    } else {
    }
    %c0_2 = arith.constant 0 : index
    %c0_3 = arith.constant 0 : index
    %4 = vector.load %arg13[%c0_2, %c0_3] : memref<8x128xf32, #tpu.memory_space<vmem>>, vector<8x128xf32>
    %5 = arith.truncf %4 : vector<8x128xf32> to vector<8x128xbf16>
    %c0_4 = arith.constant 0 : index
    %c0_5 = arith.constant 0 : index
    %c0_6 = arith.constant 0 : index
    %c0_7 = arith.constant 0 : index
    %6 = vector.load %arg5[%c0_4, %c0_5, %c0_6, %c0_7] : memref<1x1x128x128xbf16, #tpu.memory_space<vmem>>, vector<1x1x128x128xbf16>
    %7 = vector.shape_cast %6 : vector<1x1x128x128xbf16> to vector<128x128xbf16>
    %cst = arith.constant dense<0.000000e+00> : vector<8x128xf32>
    %8 = tpu.matmul %5, %7, %cst {dimension_numbers = #tpu.dot_dimension_numbers<[1], [0], [0], [1], [0, 0, 1, 1], [], []>} : vector<8x128xbf16>, vector<128x128xbf16>, vector<8x128xf32> -> vector<8x128xf32>
    %c0_8 = arith.constant 0 : index
    %c0_9 = arith.constant 0 : index
    %c0_10 = arith.constant 0 : index
    %c0_11 = arith.constant 0 : index
    %9 = vector.load %arg6[%c0_8, %c0_9, %c0_10, %c0_11] : memref<1x1x1x128xf32, #tpu.memory_space<vmem>>, vector<1x1x1x128xf32>
    %10 = vector.shape_cast %9 : vector<1x1x1x128xf32> to vector<1x128xf32>
    %11 = vector.broadcast %10 : vector<1x128xf32> to vector<8x128xf32>
    %12 = arith.addf %8, %11 : vector<8x128xf32>
    %c0_12 = arith.constant 0 : index
    %c0_13 = arith.constant 0 : index
    %c0_14 = arith.constant 0 : index
    %c0_15 = arith.constant 0 : index
    %13 = vector.load %arg7[%c0_12, %c0_13, %c0_14, %c0_15] : memref<1x1x1x128xf32, #tpu.memory_space<vmem>>, vector<1x1x1x128xf32>
    %14 = vector.shape_cast %13 : vector<1x1x1x128xf32> to vector<1x128xf32>
    %c0_16 = arith.constant 0 : index
    %c0_17 = arith.constant 0 : index
    %c0_18 = arith.constant 0 : index
    %c0_19 = arith.constant 0 : index
    %15 = vector.load %arg8[%c0_16, %c0_17, %c0_18, %c0_19] : memref<1x1x1x128xf32, #tpu.memory_space<vmem>>, vector<1x1x1x128xf32>
    %16 = vector.shape_cast %15 : vector<1x1x1x128xf32> to vector<1x128xf32>
    %cst_20 = arith.constant dense<0.000000e+00> : vector<128xf32>
    %17 = vector.multi_reduction <add>, %12, %cst_20 [0] : vector<8x128xf32> to vector<128xf32>
    %18 = vector.shape_cast %17 : vector<128xf32> to vector<1x128xf32>
    %19 = arith.mulf %12, %12 : vector<8x128xf32>
    %cst_21 = arith.constant dense<0.000000e+00> : vector<128xf32>
    %20 = vector.multi_reduction <add>, %19, %cst_21 [0] : vector<8x128xf32> to vector<128xf32>
    %21 = vector.shape_cast %20 : vector<128xf32> to vector<1x128xf32>
    %22 = tpu.concatenate %18, %21 in 0 : vector<1x128xf32>, vector<1x128xf32> -> vector<2x128xf32>
    %cst_22 = arith.constant dense<0.000000e+00> : vector<2x128xf32>
    %23 = tpu.matmul %22, %0, %cst_22 {dimension_numbers = #tpu.dot_dimension_numbers<[1], [0], [0], [1], [0, 0, 1, 1], [], []>} : vector<2x128xf32>, vector<128x128xf32>, vector<2x128xf32> -> vector<2x128xf32>
    %cst_23 = arith.constant 3.906250e-03 : f32
    %24 = vector.broadcast %cst_23 : f32 to vector<2x128xf32>
    %25 = arith.mulf %23, %24 : vector<2x128xf32>
    %26 = vector.extract_strided_slice %25 {offsets = [0, 0], sizes = [1, 128], strides = [1, 1]} : vector<2x128xf32> to vector<1x128xf32>
    %27 = vector.extract_strided_slice %25 {offsets = [1, 0], sizes = [1, 128], strides = [1, 1]} : vector<2x128xf32> to vector<1x128xf32>
    %28 = arith.mulf %26, %26 : vector<1x128xf32>
    %29 = arith.subf %27, %28 : vector<1x128xf32>
    %cst_24 = arith.constant 0.000000e+00 : f32
    %30 = vector.broadcast %cst_24 : f32 to vector<1x128xf32>
    %31 = arith.maximumf %29, %30 : vector<1x128xf32>
    %cst_25 = arith.constant 9.99999974E-6 : f32
    %32 = vector.broadcast %cst_25 : f32 to vector<1x128xf32>
    %33 = arith.addf %31, %32 : vector<1x128xf32>
    %34 = math.rsqrt %33 : vector<1x128xf32>
    %35 = arith.mulf %14, %34 : vector<1x128xf32>
    %36 = arith.mulf %26, %35 : vector<1x128xf32>
    %37 = arith.subf %16, %36 : vector<1x128xf32>
    %38 = vector.broadcast %35 : vector<1x128xf32> to vector<8x128xf32>
    %39 = arith.mulf %12, %38 : vector<8x128xf32>
    %40 = vector.broadcast %37 : vector<1x128xf32> to vector<8x128xf32>
    %41 = arith.addf %39, %40 : vector<8x128xf32>
    %c0_26 = arith.constant 0 : index
    %c0_27 = arith.constant 0 : index
    %42 = vector.load %arg13[%c0_26, %c0_27] : memref<8x128xf32, #tpu.memory_space<vmem>>, vector<8x128xf32>
    tpu.vector_store %arg13[%c0_26, %c0_27], %41 {strides = array<i32>} : memref<8x128xf32, #tpu.memory_space<vmem>>, vector<8x128xf32>,
    %c1_i32 = arith.constant 1 : i32
    %43 = arith.cmpi eq, %arg1, %c1_i32 : i32
    %44 = arith.extui %43 : i1 to i32
    %c0_i32_28 = arith.constant 0 : i32
    %45 = arith.cmpi ne, %44, %c0_i32_28 : i32
    scf.if %45 {
      %c0_29 = arith.constant 0 : index
      %c0_30 = arith.constant 0 : index
      %46 = vector.load %arg13[%c0_29, %c0_30] : memref<8x128xf32, #tpu.memory_space<vmem>>, vector<8x128xf32>
      %c0_31 = arith.constant 0 : index
      %c0_32 = arith.constant 0 : index
      %47 = vector.load %arg14[%c0_31, %c0_32] : memref<8x128xf32, #tpu.memory_space<vmem>>, vector<8x128xf32>
      %48 = arith.addf %46, %47 : vector<8x128xf32>
      %c0_33 = arith.constant 0 : index
      %c0_34 = arith.constant 0 : index
      %49 = vector.load %arg12[%c0_33, %c0_34] : memref<8x128xf32, #tpu.memory_space<vmem>>, vector<8x128xf32>
      tpu.vector_store %arg12[%c0_33, %c0_34], %48 {strides = array<i32>} : memref<8x128xf32, #tpu.memory_space<vmem>>, vector<8x128xf32>,
    } else {
    }
    return
  }
  func.func @transform_0(%arg0: i32, %arg1: i32) -> (i32, i32) {
    %c0_i32 = arith.constant 0 : i32
    %c0_i32_0 = arith.constant 0 : i32
    return %c0_i32, %arg0 : i32, i32
  }
  func.func @transform_1(%arg0: i32, %arg1: i32) -> (i32, i32, i32) {
    %c0_i32 = arith.constant 0 : i32
    %c0_i32_0 = arith.constant 0 : i32
    %c0_i32_1 = arith.constant 0 : i32
    return %arg0, %c0_i32, %c0_i32_0 : i32, i32, i32
  }
  func.func @transform_2(%arg0: i32, %arg1: i32) -> (i32, i32, i32) {
    %c0_i32 = arith.constant 0 : i32
    %c0_i32_0 = arith.constant 0 : i32
    %c0_i32_1 = arith.constant 0 : i32
    return %arg0, %c0_i32, %c0_i32_0 : i32, i32, i32
  }
  func.func @transform_3(%arg0: i32, %arg1: i32) -> (i32, i32, i32, i32) {
    %c0_i32 = arith.constant 0 : i32
    %c0_i32_0 = arith.constant 0 : i32
    %c0_i32_1 = arith.constant 0 : i32
    return %arg0, %arg1, %c0_i32, %c0_i32_0 : i32, i32, i32, i32
  }
  func.func @transform_4(%arg0: i32, %arg1: i32) -> (i32, i32, i32, i32) {
    %c0_i32 = arith.constant 0 : i32
    %c0_i32_0 = arith.constant 0 : i32
    %c0_i32_1 = arith.constant 0 : i32
    return %arg0, %arg1, %c0_i32, %c0_i32_0 : i32, i32, i32, i32
  }
  func.func @transform_5(%arg0: i32, %arg1: i32) -> (i32, i32, i32, i32) {
    %c0_i32 = arith.constant 0 : i32
    %c0_i32_0 = arith.constant 0 : i32
    %c0_i32_1 = arith.constant 0 : i32
    return %arg0, %arg1, %c0_i32, %c0_i32_0 : i32, i32, i32, i32
  }
  func.func @transform_6(%arg0: i32, %arg1: i32) -> (i32, i32, i32, i32) {
    %c0_i32 = arith.constant 0 : i32
    %c0_i32_0 = arith.constant 0 : i32
    %c0_i32_1 = arith.constant 0 : i32
    return %arg0, %arg1, %c0_i32, %c0_i32_0 : i32, i32, i32, i32
  }
  func.func @transform_7(%arg0: i32, %arg1: i32) -> (i32, i32, i32) {
    %c0_i32 = arith.constant 0 : i32
    %c0_i32_0 = arith.constant 0 : i32
    %c0_i32_1 = arith.constant 0 : i32
    return %arg0, %c0_i32, %c0_i32_0 : i32, i32, i32
  }
  func.func @transform_8(%arg0: i32, %arg1: i32) -> (i32, i32, i32) {
    %c0_i32 = arith.constant 0 : i32
    %c0_i32_0 = arith.constant 0 : i32
    %c0_i32_1 = arith.constant 0 : i32
    return %arg0, %c0_i32, %c0_i32_0 : i32, i32, i32
  }
  func.func @transform_9(%arg0: i32, %arg1: i32) -> (i32, i32) {
    %c0_i32 = arith.constant 0 : i32
    %c0_i32_0 = arith.constant 0 : i32
    %c0_i32_1 = arith.constant 0 : i32
    return %c0_i32, %c0_i32_0 : i32, i32
  }
  func.func @transform_10(%arg0: i32, %arg1: i32) -> (i32, i32) {
    %c0_i32 = arith.constant 0 : i32
    %c0_i32_0 = arith.constant 0 : i32
    return %c0_i32, %arg0 : i32, i32
  }
}

</mosaic_0001>

<bundles_post_ra>
// kernel: block_parallel_resnet_forward.1
= control target key start
LH: loop header
LB: loop body
LE: loop exit
PB: predicated region body
PF: predicated region fallthrough
CT: control target
= control target key end

     0   :  { %s1529_s13 = smov 0   ;;  %s1531_s14 = smov 0   ;;  %s1798_s0 = inlined_call_operand.vmem [shape: f32[8,64], index: 0, kind: input, shape index: {}]   ;;  %s1799_s1 = inlined_call_operand.vmem [shape: f32[1,64,256], index: 1, kind: input, shape index: {}]   ;;  %s1800_s2 = inlined_call_operand.vmem [shape: f32[1,1,256], index: 2, kind: input, shape index: {}]   ;;  %s1801_s3 = inlined_call_operand.vmem [shape: bf16[1,2,128,128], index: 3, kind: input, shape index: {}]   ;;  %s1802_s4 = inlined_call_operand.vmem [shape: f32[1,2,1,128], index: 4, kind: input, shape index: {}]   ;;  %s1803_s5 = inlined_call_operand.vmem [shape: f32[1,2,1,128], index: 5, kind: input, shape index: {}]   ;;  %s1804_s6 = inlined_call_operand.vmem [shape: f32[1,2,1,128], index: 6, kind: input, shape index: {}]   ;;  %s1805_s7 = inlined_call_operand.vmem [shape: f32[1,1,128], index: 7, kind: input, shape index: {}]   ;;  %s1806_s8 = inlined_call_operand.vmem [shape: f32[1,1,128], index: 8, kind: input, shape index: {}]   ;;  %s1807_s9 = inlined_call_operand.vmem [shape: f32[128,128], index: 9, kind: input, shape index: {}]   ;;  %s1808_s10 = inlined_call_operand.vmem [shape: f32[8,128], index: 10, kind: output, shape index: {}]  }
   0x1   :  { %s1533_s15 = smov 0  }
   0x2 LB: > { %s29_s16 = sadd.s32 1, %s1462_s14  ;;  %p1250_p0 = scmp.ge.s32.totalorder %s1466_s15, 1  ;;  %s1466_s15 = sphi %s1533_s15, %s20_s15   ;;  %s1462_s14 = sphi %s1531_s14, %s1810_s14   ;;  %s1458_s13 = sphi %s1529_s13, %s1809_s13  }
   0x3   : > { %p30_p1 = scmp.ge.s32.totalorder %s29_s16, 2  ;;  %p416_p2 = scmp.lt.s32.totalorder %s1466_s15, 3 }
   0x5   : > { %s1812_s16 = smov (%p30_p1, %s29_s16), 0  ;;  %p417_p3 = pnand %p1250_p0, %p416_p2 }
   0x6   : > { %p512_p4 = scmp.lt.s32.totalorder (!%p417_p3), %s1458_s13, 1  ;;  %p1253_p5 = scmp.ne.s32.totalorder (!%p417_p3), %s1458_s13, 0 }
   0x7   : > { %420 = sbr.rel (%p417_p3) target bundleno = 972 (0x3cc), region = 60 }
   0xc   : > { %v1553_v0 = vld [vmem:[%s1807_s9] sm:$0xff]  ;;  %v1558_v1 = vld [vmem:[%s1807_s9 + $0x8] sm:$0xff]  ;;  %v1563_v2 = vld [vmem:[%s1807_s9 + $0x10] sm:$0xff]  ;;  %s1581_s29 = scalar_select %p512_p4, %s1458_s13, 1 }
   0xd   : > { %v1568_v3 = vld [vmem:[%s1807_s9 + $0x18] sm:$0xff]  ;;  %v1573_v4 = vld [vmem:[%s1807_s9 + $0x20] sm:$0xff]  ;;  %v1578_v5 = vld [vmem:[%s1807_s9 + $0x28] sm:$0xff]  ;;  %570 = sbr.rel (%p1253_p5) target bundleno = 483 (0x1e3), region = 64 }
   0xe   : > { %v1586_v6 = vld [vmem:[%s1807_s9 + $0x30] sm:$0xff]  ;;  %v1591_v7 = vld [vmem:[%s1807_s9 + $0x38] sm:$0xff]  ;;  %v1596_v8 = vld [vmem:[%s1807_s9 + $0x40] sm:$0xff]  ;;  %s1268_s26 = sshll.u32 %s1581_s29, 6  ;;  %s525_s30 = scalar_lea.vmem %s1802_s4, %s1581_s29 }
   0xf   : > { %v1601_v9 = vld [vmem:[%s1807_s9 + $0x48] sm:$0xff]  ;;  %v1606_v10 = vld [vmem:[%s1807_s9 + $0x50] sm:$0xff]  ;;  %v1611_v11 = vld [vmem:[%s1807_s9 + $0x58] sm:$0xff]  ;;  %s1636_s23 = scalar_lea.vmem %s1801_s3, %s1268_s26  ;;  %s532_s27 = scalar_lea.vmem %s1803_s5, %s1581_s29 }
  0x10   : > { %v1621_v12 = vld [vmem:[%s1807_s9 + $0x60] sm:$0xff]  ;;  %v1626_v13 = vld [vmem:[%s1807_s9 + $0x68] sm:$0xff]  ;;  %v1631_v14 = vld [vmem:[%s1807_s9 + $0x70] sm:$0xff]  ;;  %s539_s18 = scalar_lea.vmem %s1804_s6, %s1581_s29 }
  0x11   : > { %v1645_v15 = vld [vmem:[%s1807_s9 + $0x78] sm:$0xff] }
  0x12   : > { %v587_v16 = vld [vmem:[%s1799_s1 + $0x78] sm:$0xff]  ;;  %v586_v17 = vld [vmem:[%s1799_s1 + $0x70] sm:$0xff]  ;;  %v585_v18 = vld [vmem:[%s1799_s1 + $0x68] sm:$0xff]  ;;  %v1468_v20 = vmov 0.0   ;;  %vm600_vm0 = vcmask 523264   ;;  %vm1469_vm1 = vmmov 0   ;;  %v590_v34 = vlaneseq }
  0x13   : > { %620 = vmatprep.subr.mxu0 %v587_v16  ;;  %v584_v19 = vld [vmem:[%s1799_s1 + $0x60] sm:$0xff]  ;;  %668 = vmatprep.mubr.f32.mxu0 %v1468_v20  ;;  %v583_v21 = vld [vmem:[%s1799_s1 + $0x58] sm:$0xff]  ;;  %v582_v22 = vld [vmem:[%s1799_s1 + $0x50] sm:$0xff]  ;;  %vm692_vm2 = vcmask 1040384  }
  0x14   : > { %621 = vmatpush1.msra.mxu0 %v586_v17  ;;  %1312 = vmatprep.subr.mxu1 %v1468_v20  ;;  %v581_v23 = vld [vmem:[%s1799_s1 + $0x48] sm:$0xff]  ;;  %v580_v24 = vld [vmem:[%s1799_s1 + $0x40] sm:$0xff]  ;;  %v579_v25 = vld [vmem:[%s1799_s1 + $0x38] sm:$0xff]  ;;  %v591_v35 = vshrl.u32 %v590_v34, 7 }
  0x15   : > { %622 = vmatprep.subr.mxu0 %v585_v18  ;;  %1313 = vmatpush3.msra.mxu1 %v1645_v15  ;;  %v578_v26 = vld [vmem:[%s1799_s1 + $0x30] sm:$0xff]  ;;  %v577_v27 = vld [vmem:[%s1799_s1 + $0x28] sm:$0xff]  ;;  %v576_v28 = vld [vmem:[%s1799_s1 + $0x20] sm:$0xff] }
  0x16   : > { %623 = vmatpush1.msra.mxu0 %v584_v19  ;;  %1314 = vmatprep.subr.mxu1 %v1468_v20  ;;  %v575_v29 = vld [vmem:[%s1799_s1 + $0x18] sm:$0xff]  ;;  %v574_v30 = vld [vmem:[%s1799_s1 + $0x10] sm:$0xff]  ;;  %v573_v31 = vld [vmem:[%s1799_s1 + $0x8] sm:$0xff]  ;;  %v592_v36 = vsub.s32 0, %v591_v35  ;;  %v596_v38 = vsub.s32 1, %v591_v35 }
  0x17   : > { %624 = vmatprep.subr.mxu0 %v583_v21  ;;  %1315 = vmatpush3.msra.mxu1 %v1631_v14  ;;  %v572_v32 = vld [vmem:[%s1799_s1] sm:$0xff] }
  0x18   : > { %625 = vmatpush1.msra.mxu0 %v582_v22  ;;  %1316 = vmatprep.subr.mxu1 %v1468_v20  ;;  %v571_v33 = vld [vmem:[%s1798_s0] sm:$0xff] }
  0x19   : > { %626 = vmatprep.subr.mxu0 %v581_v23  ;;  %1317 = vmatpush3.msra.mxu1 %v1626_v13  ;;  %v588_v37 = vld [vmem:[%s1800_s2] sm:$0x3] }
  0x1a   : > { %627 = vmatpush1.msra.mxu0 %v580_v24  ;;  %1318 = vmatprep.subr.mxu1 %v1468_v20  ;;  %v593_v39 = vrot.slane %v588_v37, %v592_v36  ;;  %v597_v40 = vrot.slane %v588_v37, %v596_v38 }
  0x1b   : > { %628 = vmatprep.subr.mxu0 %v579_v25  ;;  %1319 = vmatpush3.msra.mxu1 %v1621_v12 }
  0x1c   : > { %629 = vmatpush1.msra.mxu0 %v578_v26  ;;  %1320 = vmatprep.subr.mxu1 %v1468_v20 }
  0x1d   : > { %630 = vmatprep.subr.mxu0 %v577_v27  ;;  %1321 = vmatpush3.msra.mxu1 %v1611_v11  ;;  %v677_v27 = vld [vmem:[%s1805_s7] sm:$0x1] }
  0x1e   : > { %631 = vmatpush1.msra.mxu0 %v576_v28  ;;  %1322 = vmatprep.subr.mxu1 %v1468_v20 }
  0x1f   : > { %632 = vmatprep.subr.mxu0 %v575_v29  ;;  %1323 = vmatpush3.msra.mxu1 %v1606_v10 }
  0x20   : > { %633 = vmatpush1.msra.mxu0 %v574_v30  ;;  %1324 = vmatprep.subr.mxu1 %v1468_v20  ;;  %v678_v30 = vld [vmem:[%s1806_s8] sm:$0x1] }
  0x21   : > { %634 = vmatprep.subr.mxu0 %v573_v31  ;;  %1325 = vmatpush3.msra.mxu1 %v1601_v9 }
  0x22   : > { %635 = vmatpush1.msra.mxu0 %v572_v32  ;;  %1326 = vmatprep.subr.mxu1 %v1468_v20 }
  0x23   : > { %1254 = vmatmul.mubr.msk.f32.vlgmr.msra.gmra.mxu0 %vm600_vm0, %v571_v33  ;;  %1327 = vmatpush3.msra.mxu1 %v1596_v8 }
  0x24   : > { %1328 = vmatprep.subr.mxu1 %v1468_v20  ;;  %1344 = vmatprep.mubr.msk.f32.mxu1 %vm1469_vm1, %v1468_v20 }
  0x25   : > { %1329 = vmatpush3.msra.mxu1 %v1591_v7 }
  0x26   : > { %1330 = vmatprep.subr.mxu1 %v1468_v20 }
  0x27   : > { %1331 = vmatpush3.msra.mxu1 %v1586_v6 }
  0x28   : > { %1332 = vmatprep.subr.mxu1 %v1468_v20 }
  0x29   : > { %1333 = vmatpush3.msra.mxu1 %v1578_v5 }
  0x2a   : > { %1334 = vmatprep.subr.mxu1 %v1468_v20 }
  0x2b   : > { %1335 = vmatpush3.msra.mxu1 %v1573_v4 }
  0x2c   : > { %1336 = vmatprep.subr.mxu1 %v1468_v20 }
  0x2d   : > { %1337 = vmatpush3.msra.mxu1 %v1568_v3 }
  0x2e   : > { %1338 = vmatprep.subr.mxu1 %v1468_v20 }
  0x2f   : > { %1339 = vmatpush3.msra.mxu1 %v1563_v2 }
  0x30   : > { %1340 = vmatprep.subr.mxu1 %v1468_v20 }
  0x31   : > { %1341 = vmatpush3.msra.mxu1 %v1558_v1 }
  0x32   : > { %1342 = vmatprep.subr.mxu1 %v1468_v20  ;;  %v1470_v20 = vmov 1966171168  }
  0x33   : > { %1343 = vmatpush3.msra.mxu1 %v1553_v0  ;;  %v775_v21 = vunpack.c.l.s4 %v1470_v20 }
  0x35   : > { %v776_v22 = vunpack.c.0.s8 %v775_v21 }
  0x37   : > { %v779_v23 = vsub.s32 %v776_v22, %v591_v35 }
  0xe3   : > { %v670_v41 = vpop.f32.mrf.mxu0 }
  0xe4   : > { %v671_v42 = vadd.f32 %v670_v41, %v593_v39 }
  0xe5   : > { %v672_v43 = vpop.f32.mrf.mxu0 }
  0xe6   : > { %v675_v44 = vmax.f32 %v671_v42, 0.0  ;;  %v673_v45 = vadd.f32 %v672_v43, %v597_v40 }
  0xe8   : > { %676 = vst [vmem:[#allocation2] sm:$0xff] %v675_v44  ;;  %v679_v46 = vrot.slane %v673_v45, 4  ;;  %v685_v47 = vmul.f32 %v673_v45, %v673_v45 }
  0xea   : > { %v680_v48 = vadd.f32 %v679_v46, %v673_v45  ;;  %v686_v49 = vrot.slane %v685_v47, 4 }
  0xec   : > { %v681_v50 = vrot.slane %v680_v48, 2  ;;  %v687_v51 = vadd.f32 %v686_v49, %v685_v47 }
  0xee   : > { %v682_v52 = vadd.f32 %v681_v50, %v680_v48  ;;  %v688_v53 = vrot.slane %v687_v51, 2 }
  0xf0   : > { %v683_v54 = vrot.slane %v682_v52, 1  ;;  %v689_v55 = vadd.f32 %v688_v53, %v687_v51 }
  0xf2   : > { %v690_v56 = vrot.slane %v689_v55, 1  ;;  %v684_v57 = vadd.f32 %v683_v54, %v682_v52 }
  0xf4   : > { %v691_v58 = vadd.f32 %v690_v56, %v689_v55 }
  0xf6   : > { %v693_v59 = vsel %vm692_vm2, %v684_v57, %v691_v58 }
  0xf7   : > { %1345 = vmatmul.mubr.f32.vlgmr.msra.gmra.mxu1 %v693_v59 }
 0x1b7   : > { %v760_v60 = vpop.f32.mrf.mxu1 }
 0x1b8   : > { %v764_v61 = vmul.f32 0.00390625, %v760_v60 }
 0x1b9   : > { %v1346_v62 = vpop.f32.mrf.mxu1 }
 0x1ba   : > { %v765_v63 = vmul.f32 %v764_v61, %v764_v61 }
 0x1bc   : > { %v767_v16 = vrot.slane %v765_v63, 7 }
 0x1be   : > { %v769_v17 = vsub.f32 %v764_v61, %v767_v16 }
 0x1c0   : > { %v770_v18 = vmax.f32 %v769_v17, 0.0 }
 0x1c2   : > { %v771_v19 = vadd.f32 1e-05, %v770_v18 }
 0x1c4   : > { %1432 = vrsqrt.f32 %v771_v19 }
 0x1d1   : > { %v1433_v24 = vpop.eup %1432 }
 0x1d2   : > { %v780_v25 = vrot.slane %v1433_v24, %v779_v23 }
 0x1d4   : > { %v781_v26 = vcombine.high %v780_v25, %v780_v25 }
 0x1d6   : > { %v788_v28 = vrot.slane %v781_v26, %v779_v23 }
 0x1d8   : > { %v790_v29 = vmul.f32 %v788_v28, %v677_v27 }
 0x1da   : > { %v791_v31 = vmul.f32 %v790_v29, %v764_v61  ;;  %v797_v32 = vrot.slane %v790_v29, %v592_v36 }
 0x1dc   : > { %v792_v33 = vsub.f32 %v678_v30, %v791_v31  ;;  %v799_v34 = vmul.f32 %v797_v32, %v673_v45 }
 0x1de   : > { %v804_v37 = vrot.slane %v792_v33, %v592_v36 }
 0x1e0   : > { %v806_v38 = vadd.f32 %v804_v37, %v799_v34 }
 0x1e2   : > { %807 = vst [vmem:[#allocation3] sm:$0xff] %v806_v38 }
 0x1e3 PF: > { %v1434_v35 = vld [vmem:[%s1636_s23 + $0x38] sm:$0xff]   ;;  %v1471_v39 = vmov 0.0   ;;  %v1435_v40 = vld [vmem:[%s1636_s23 + $0x30] sm:$0xff]   ;;  %vm1472_vm3 = vmmov 0   ;;  %v1436_v36 = vld [vmem:[%s1636_s23 + $0x28] sm:$0xff]   ;;  %vm936_vm4 = vcmask 1040384   ;;  %v1021_v62 = vlaneseq }
 0x1e4   : > { %1347 = vmatprep.subr.bf16.mxu0 %v1471_v39  ;;  %1367 = vmatprep.subr.mxu1 %v1471_v39  ;;  %v1437_v41 = vld [vmem:[%s1636_s23 + $0x20] sm:$0xff]   ;;  %v1473_v60 = vmov 1966171168   ;;  %p1264_p6 = scmp.ne.s32.totalorder %s1458_s13, 1 }
 0x1e5   : > { %1348 = vmatpush3.bf16.msra.mxu0 %v1434_v35  ;;  %1363 = vmatprep.mubr.msk.bf16.mxu0 %vm1472_vm3, %v1471_v39  ;;  %v1019_v61 = vunpack.c.l.s4 %v1473_v60  ;;  %v1022_v16 = vshrl.u32 %v1021_v62, 7  ;;  %v921_v21 = vld [vmem:[%s532_s27] sm:$0x1] }
 0x1e6   : > { %1349 = vmatprep.subr.bf16.mxu0 %v1471_v39  ;;  %1368 = vmatpush3.msra.mxu1 %v1645_v15  ;;  %v922_v25 = vld [vmem:[%s539_s18] sm:$0x1] }
 0x1e7   : > { %1369 = vmatprep.subr.mxu1 %v1471_v39  ;;  %1399 = vmatprep.mubr.msk.f32.mxu1 %vm1472_vm3, %v1471_v39  ;;  %v1020_v63 = vunpack.c.0.s8 %v1019_v61  ;;  %v1040_v23 = vsub.s32 0, %v1022_v16 }
 0x1e8   : > { %1370 = vmatpush3.msra.mxu1 %v1631_v14  ;;  %v1438_v14 = vld [vmem:[%s1636_s23 + $0x18] sm:$0xff]  }
 0x1e9   : > { %1350 = vmatpush3.bf16.msra.mxu0 %v1435_v40  ;;  %1371 = vmatprep.subr.mxu1 %v1471_v39  ;;  %v1023_v17 = vsub.s32 %v1020_v63, %v1022_v16 }
 0x1ea   : > { %1351 = vmatprep.subr.bf16.mxu0 %v1471_v39  ;;  %1372 = vmatpush3.msra.mxu1 %v1626_v13 }
 0x1eb   : > { %1373 = vmatprep.subr.mxu1 %v1471_v39 }
 0x1ec   : > { %1374 = vmatpush3.msra.mxu1 %v1621_v12  ;;  %v1439_v12 = vld [vmem:[%s1636_s23 + $0x10] sm:$0xff]  }
 0x1ed   : > { %1352 = vmatpush3.bf16.msra.mxu0 %v1436_v36  ;;  %1375 = vmatprep.subr.mxu1 %v1471_v39 }
 0x1ee   : > { %1353 = vmatprep.subr.bf16.mxu0 %v1471_v39  ;;  %1376 = vmatpush3.msra.mxu1 %v1611_v11 }
 0x1ef   : > { %1377 = vmatprep.subr.mxu1 %v1471_v39 }
 0x1f0   : > { %1378 = vmatpush3.msra.mxu1 %v1606_v10  ;;  %v1440_v10 = vld [vmem:[%s1636_s23 + $0x8] sm:$0xff]  }
 0x1f1   : > { %1354 = vmatpush3.bf16.msra.mxu0 %v1437_v41  ;;  %1379 = vmatprep.subr.mxu1 %v1471_v39 }
 0x1f2   : > { %1355 = vmatprep.subr.bf16.mxu0 %v1471_v39  ;;  %1380 = vmatpush3.msra.mxu1 %v1601_v9  ;;  %v808_v9 = vld [vmem:[#allocation2] sm:$0xff] }
 0x1f3   : > { %1381 = vmatprep.subr.mxu1 %v1471_v39 }
 0x1f4   : > { %1382 = vmatpush3.msra.mxu1 %v1596_v8  ;;  %v1441_v8 = vld [vmem:[%s1636_s23] sm:$0xff]  }
 0x1f5   : > { %1356 = vmatpush3.bf16.msra.mxu0 %v1438_v14  ;;  %1383 = vmatprep.subr.mxu1 %v1471_v39 }
 0x1f6   : > { %1357 = vmatprep.subr.bf16.mxu0 %v1471_v39  ;;  %1384 = vmatpush3.msra.mxu1 %v1591_v7  ;;  %v809_v7 = vpack.c.bf16 %v808_v9, %v808_v9 }
 0x1f7   : > { %1385 = vmatprep.subr.mxu1 %v1471_v39 }
 0x1f8   : > { %1386 = vmatpush3.msra.mxu1 %v1586_v6 }
 0x1f9   : > { %1358 = vmatpush3.bf16.msra.mxu0 %v1439_v12  ;;  %1387 = vmatprep.subr.mxu1 %v1471_v39 }
 0x1fa   : > { %1359 = vmatprep.subr.bf16.mxu0 %v1471_v39  ;;  %1388 = vmatpush3.msra.mxu1 %v1578_v5 }
 0x1fb   : > { %1389 = vmatprep.subr.mxu1 %v1471_v39 }
 0x1fc   : > { %1390 = vmatpush3.msra.mxu1 %v1573_v4  ;;  %v1255_v4 = vld [vmem:[%s525_s30] ss:$0 sm:$0xff] }
 0x1fd   : > { %1360 = vmatpush3.bf16.msra.mxu0 %v1440_v10  ;;  %1391 = vmatprep.subr.mxu1 %v1471_v39 }
 0x1fe   : > { %1361 = vmatprep.subr.bf16.mxu0 %v1471_v39  ;;  %1392 = vmatpush3.msra.mxu1 %v1568_v3 }
 0x1ff   : > { %1393 = vmatprep.subr.mxu1 %v1471_v39 }
 0x200   : > { %1394 = vmatpush3.msra.mxu1 %v1563_v2 }
 0x201   : > { %1362 = vmatpush3.bf16.msra.mxu0 %v1441_v8  ;;  %1395 = vmatprep.subr.mxu1 %v1471_v39 }
 0x202   : > { %1396 = vmatpush3.msra.mxu1 %v1558_v1 }
 0x203   : > { %1397 = vmatprep.subr.mxu1 %v1471_v39 }
 0x204   : > { %1364 = vmatmul.mubr.bf16.vlgmr.msra.gmra.mxu0 %v809_v7  ;;  %1398 = vmatpush3.msra.mxu1 %v1553_v0 }
 0x2c4   : > { %v915_v5 = vpop.f32.mrf.mxu0 }
 0x2c5   : > { %v916_v6 = vadd.f32 %v1255_v4, %v915_v5 }
 0x2c6   : > { %v1365_v3 = vpop.f32.mrf.mxu0 }
 0x2c7   : > { %v923_v11 = vrot.slane %v916_v6, 4  ;;  %v929_v13 = vmul.f32 %v916_v6, %v916_v6 }
 0x2c8   : > { %v918_v15 = vpop.f32.mrf.mxu0 }
 0x2c9   : > { %v924_v2 = vadd.f32 %v923_v11, %v916_v6  ;;  %v930_v42 = vrot.slane %v929_v13, 4 }
 0x2ca   : > { %v1366_v43 = vpop.f32.mrf.mxu0 }
 0x2cb   : > { %v925_v44 = vrot.slane %v924_v2, 2  ;;  %v931_v1 = vadd.f32 %v930_v42, %v929_v13 }
 0x2cd   : > { %v926_v45 = vadd.f32 %v925_v44, %v924_v2  ;;  %v932_v46 = vrot.slane %v931_v1, 2 }
 0x2cf   : > { %v927_v47 = vrot.slane %v926_v45, 1  ;;  %v933_v0 = vadd.f32 %v932_v46, %v931_v1 }
 0x2d1   : > { %v934_v48 = vrot.slane %v933_v0, 1  ;;  %v928_v49 = vadd.f32 %v927_v47, %v926_v45 }
 0x2d3   : > { %v935_v50 = vadd.f32 %v934_v48, %v933_v0 }
 0x2d5   : > { %v937_v51 = vsel %vm936_vm4, %v928_v49, %v935_v50 }
 0x2d6   : > { %1400 = vmatmul.mubr.f32.vlgmr.msra.gmra.mxu1 %v937_v51 }
 0x396   : > { %v1004_v52 = vpop.f32.mrf.mxu1 }
 0x397   : > { %v1008_v53 = vmul.f32 0.00390625, %v1004_v52 }
 0x398   : > { %v1401_v54 = vpop.f32.mrf.mxu1 }
 0x399   : > { %v1009_v55 = vmul.f32 %v1008_v53, %v1008_v53 }
 0x39b   : > { %v1011_v56 = vrot.slane %v1009_v55, 7 }
 0x39d   : > { %v1013_v57 = vsub.f32 %v1008_v53, %v1011_v56 }
 0x39f   : > { %v1014_v58 = vmax.f32 %v1013_v57, 0.0 }
 0x3a1   : > { %v1015_v59 = vadd.f32 1e-05, %v1014_v58 }
 0x3a3   : > { %1442 = vrsqrt.f32 %v1015_v59 }
 0x3b0   : > { %v1443_v18 = vpop.eup %1442 }
 0x3b1   : > { %v1024_v19 = vrot.slane %v1443_v18, %v1023_v17 }
 0x3b3   : > { %v1025_v20 = vcombine.high %v1024_v19, %v1024_v19 }
 0x3b5   : > { %v1032_v22 = vrot.slane %v1025_v20, %v1023_v17 }
 0x3b7   : > { %v1034_v24 = vmul.f32 %v1032_v22, %v921_v21 }
 0x3b9   : > { %v1035_v26 = vmul.f32 %v1034_v24, %v1008_v53  ;;  %v1041_v27 = vrot.slane %v1034_v24, %v1040_v23 }
 0x3bb   : > { %v1036_v28 = vsub.f32 %v922_v25, %v1035_v26  ;;  %v1043_v29 = vmul.f32 %v1041_v27, %v916_v6 }
 0x3bd   : > { %v1048_v30 = vrot.slane %v1036_v28, %v1040_v23  ;;  %1055 = sbr.rel (%p1264_p6) target bundleno = 972 (0x3cc), region = 68 }
 0x3bf   : > { %v1050_v31 = vadd.f32 %v1048_v30, %v1043_v29 }
 0x3c1   : > { %1051 = vst [vmem:[#allocation2] sm:$0xff] %v1050_v31 }
 0x3c2   : > { %v1057_v33 = vld [vmem:[#allocation3] sm:$0xff] }
 0x3c8   : > { %v1056_v32 = vld [vmem:[#allocation2] sm:$0xff] }
 0x3c9   : > { %v1058_v34 = vadd.f32 %v1057_v33, %v1056_v32 }
 0x3cb   : > { %1059 = vst [vmem:[%s1808_s10] sm:$0xff] %v1058_v34 }
 0x3cc PF: > { %s20_s15 = sadd.s32 1, %s1466_s15   ;;  %s1809_s13 = smov %s1462_s14 }
 0x3cd   : > { %p17_p7 = scmp.ge.s32.totalorder %s20_s15, 4   ;;  %s1810_s14 = smov %s1812_s16 }
 0x3cf   :  { %19 = sbr.rel (!%p17_p7) target bundleno = 2 (0x2), region = 122 }

</bundles_post_ra>
